<compile_context>
chip_gen: v5e
topology: v5e:2x2
jax: 0.10.0
libtpu: 0.0.40
codegen_flags: <defaults>
</compile_context>

<pallas_src>
import math
import functools

import jax
import jax.numpy as jnp
from jax.experimental import pallas as pl
from jax.experimental.pallas import tpu as pltpu


WDTYPE = jnp.bfloat16   # weight storage dtype in HBM (halves weight streaming bytes)


# ----------------------------------------------------------------------------
# small in-kernel helpers
# ----------------------------------------------------------------------------
def _layernorm(v, eps=1e-6):
    mu = jnp.mean(v, axis=-1, keepdims=True)
    var = jnp.mean((v - mu) ** 2, axis=-1, keepdims=True)
    return (v - mu) * jax.lax.rsqrt(var + eps)


def _gelu_tanh(z):
    return 0.5 * z * (1.0 + jnp.tanh(jnp.sqrt(2.0 / jnp.pi) * (z + 0.044715 * z * z * z)))


def _bf16_dot(x_f32, w_bf16, b_f32):
    """y = x @ W + b with bf16 MXU inputs, f32 accumulation. W is [in, out]."""
    y = jnp.dot(x_f32.astype(jnp.bfloat16), w_bf16,
                preferred_element_type=jnp.float32)
    return y + b_f32.astype(jnp.float32)


# ----------------------------------------------------------------------------
# BlockSpec helpers
# ----------------------------------------------------------------------------
def _const_spec(shape):
    """Whole-array block, same block for every grid step (stays VMEM-resident)."""
    nd = len(shape)
    return pl.BlockSpec(shape, lambda l, _nd=nd: (0,) * _nd)


def _layer_spec(stacked_shape):
    """Per-layer slice of a weight stacked along a leading layer axis."""
    nd = len(stacked_shape)
    block = (1,) + tuple(stacked_shape[1:])
    return pl.BlockSpec(block, lambda l, _nd=nd: (l,) + (0,) * (_nd - 1))


# ----------------------------------------------------------------------------
# head kernel: TimestepEmbedder MLP + patch_embedding + cond_mapper + add
# ----------------------------------------------------------------------------
def _head_kernel(freq_ref, xg_ref, cond_ref,
                 w_t1_ref, b_t1_ref, w_t2_ref, b_t2_ref,
                 w_p_ref, b_p_ref, w_c_ref, b_c_ref,
                 xemb_ref, c_ref):
    # t_emb = Linear(SiLU(Linear(sinusoidal(t))))
    h = _bf16_dot(freq_ref[...].astype(jnp.float32), w_t1_ref[...], b_t1_ref[...])
    h = h * jax.nn.sigmoid(h)
    t_emb = _bf16_dot(h, w_t2_ref[...], b_t2_ref[...])

    # cond_mapper(cond);  c = t_emb + cond
    cond_h = _bf16_dot(cond_ref[...].astype(jnp.float32), w_c_ref[...], b_c_ref[...])
    c_ref[...] = (t_emb + cond_h).astype(c_ref.dtype)

    # x_emb = patch_embedding(x_gene)
    xemb_ref[...] = _bf16_dot(xg_ref[...].astype(jnp.float32),
                              w_p_ref[...], b_p_ref[...]).astype(xemb_ref.dtype)


# ----------------------------------------------------------------------------
# fused adaLN-Zero blocks + output_layer, grid = (num_layers,)
# ----------------------------------------------------------------------------
def _blocks_kernel(x_ref, c_ref,
                   w_ada_ref, b_ada_ref,
                   w_v_ref, b_v_ref,
                   w_proj_ref, b_proj_ref,
                   w_fc1_ref, b_fc1_ref,
                   w_fc2_ref, b_fc2_ref,
                   w_out_ref, b_out_ref,
                   o_ref, x_sc):
    l = pl.program_id(0)

    @pl.when(l == 0)
    def _():
        x_sc[...] = x_ref[...].astype(jnp.float32)

    x = x_sc[...]
    c = c_ref[...].astype(jnp.float32)
    c_silu = (c * jax.nn.sigmoid(c)).astype(jnp.bfloat16)

    # adaLN modulation: Linear(SiLU(c)) -> 6 chunks; chunks are leading-axis slices
    def mod_chunk(k):
        y = jnp.dot(c_silu, w_ada_ref[0, k], preferred_element_type=jnp.float32)
        return y + b_ada_ref[0, k].astype(jnp.float32)

    shift_msa, scale_msa, gate_msa = mod_chunk(0), mod_chunk(1), mod_chunk(2)
    shift_mlp, scale_mlp, gate_mlp = mod_chunk(3), mod_chunk(4), mod_chunk(5)

    # attention branch: seq_len == 1  =>  softmax over one key == 1
    #                   =>  attn(x) == out_proj(V(x));  Q/K weights never loaded
    h = _layernorm(x) * (1.0 + scale_msa) + shift_msa
    v = _bf16_dot(h, w_v_ref[0], b_v_ref[0])
    attn = _bf16_dot(v, w_proj_ref[0], b_proj_ref[0])
    x = x + gate_msa * attn

    # MLP branch
    h2 = _layernorm(x) * (1.0 + scale_mlp) + shift_mlp
    z = _bf16_dot(h2, w_fc1_ref[0], b_fc1_ref[0])
    z = _gelu_tanh(z)
    mlp = _bf16_dot(z, w_fc2_ref[0], b_fc2_ref[0])
    x = x + gate_mlp * mlp

    x_sc[...] = x

    # fused output_layer on the last grid step
    @pl.when(l == pl.num_programs(0) - 1)
    def _():
        o_ref[...] = _bf16_dot(x, w_out_ref[...], b_out_ref[...]).astype(o_ref.dtype)


# ----------------------------------------------------------------------------
# TimestepEmbedder sinusoidal part (tiny glue, plain JAX)
# ----------------------------------------------------------------------------
def timestep_embedding(t, dim=256, max_period=10000):
    half = dim // 2
    freqs = jnp.exp(-math.log(max_period) * jnp.arange(half, dtype=jnp.float32) / half)
    args = t.astype(jnp.float32)[:, None] * freqs[None, :]
    return jnp.concatenate([jnp.cos(args), jnp.sin(args)], axis=-1)


# ----------------------------------------------------------------------------
# parameter init (deterministic, synthetic; weights pre-transposed to [in, out])
# ----------------------------------------------------------------------------
def init_params(key, input_dim, hidden, num_layers, mlp_ratio, cond_dim, freq_dim=256):
    dh = int(hidden * mlp_ratio)
    L, H = num_layers, hidden
    keys = iter(jax.random.split(key, 10 + 10 * num_layers))

    def w(shape):
        return (jax.random.normal(next(keys), shape, jnp.float32) * 0.02).astype(WDTYPE)

    def b(shape):
        return jax.random.normal(next(keys), shape, jnp.float32) * 0.02

    params = {
        # head
        "w_t1": w((freq_dim, H)),     "b_t1": b((1, H)),
        "w_t2": w((H, H)),            "b_t2": b((1, H)),
        "w_patch": w((input_dim, H)), "b_patch": b((1, H)),
        "w_cond": w((cond_dim, H)),   "b_cond": b((1, H)),
        # per-layer block weights, stacked along a leading layer axis
        "w_ada":  w((L, 6, H, H)),    "b_ada":  b((L, 6, 1, H)),
        # only the V slice of QKV (with real PyTorch weights: qkv_w[2H:3H].T, qkv_b[2H:3H])
        "w_v":    w((L, H, H)),       "b_v":    b((L, 1, H)),
        "w_proj": w((L, H, H)),       "b_proj": b((L, 1, H)),
        "w_fc1":  w((L, H, dh)),      "b_fc1":  b((L, 1, dh)),
        "w_fc2":  w((L, dh, H)),      "b_fc2":  b((L, 1, H)),
        # output layer
        "w_out":  w((H, input_dim)),  "b_out":  b((1, input_dim)),
    }
    return params


# ----------------------------------------------------------------------------
# full forward
# ----------------------------------------------------------------------------
def conditional_dit_forward(params, x_gene, t, cond):
    B = x_gene.shape[0]
    H = params["w_t2"].shape[0]
    input_dim = params["w_out"].shape[1]
    L = params["w_ada"].shape[0]
    DH = params["w_fc1"].shape[2]
    freq_dim = params["w_t1"].shape[0]

    freq = timestep_embedding(t, freq_dim)                        # (B, freq_dim)

    # --- head: t_emb MLP + patch_embedding + cond_mapper fused in one call ----
    head_args = (freq, x_gene, cond,
                 params["w_t1"], params["b_t1"], params["w_t2"], params["b_t2"],
                 params["w_patch"], params["b_patch"],
                 params["w_cond"], params["b_cond"])
    x_emb, c = pl.pallas_call(
        _head_kernel,
        out_shape=(jax.ShapeDtypeStruct((B, H), jnp.float32),
                   jax.ShapeDtypeStruct((B, H), jnp.float32)),
        grid=(1,),
        in_specs=[_const_spec(a.shape) for a in head_args],
        out_specs=(_const_spec((B, H)), _const_spec((B, H))),
        compiler_params=pltpu.CompilerParams(dimension_semantics=("arbitrary",)),
    )(*head_args)

    # --- blocks + output_layer: single layer-gridded, double-buffered call ----
    blk_args = (x_emb, c,
                params["w_ada"], params["b_ada"],
                params["w_v"], params["b_v"],
                params["w_proj"], params["b_proj"],
                params["w_fc1"], params["b_fc1"],
                params["w_fc2"], params["b_fc2"],
                params["w_out"], params["b_out"])
    in_specs = (
        [_const_spec(x_emb.shape), _const_spec(c.shape)]
        + [_layer_spec(params[k].shape)
           for k in ("w_ada", "b_ada", "w_v", "b_v", "w_proj", "b_proj",
                     "w_fc1", "b_fc1", "w_fc2", "b_fc2")]
        + [_const_spec(params["w_out"].shape), _const_spec(params["b_out"].shape)]
    )

    per_layer_params = 6 * H * H + 2 * H * H + 2 * H * DH
    cost = pl.CostEstimate(
        flops=2 * B * (L * per_layer_params + H * input_dim),
        transcendentals=B * L * (7 * H + DH),
        bytes_accessed=2 * (L * per_layer_params + H * input_dim)  # bf16 weights dominate
        + 4 * L * (6 * H + 4 * H + DH)                             # f32 biases
        + 4 * B * (2 * H + input_dim),
    )

    out = pl.pallas_call(
        _blocks_kernel,
        out_shape=jax.ShapeDtypeStruct((B, input_dim), x_gene.dtype),
        grid=(L,),
        in_specs=in_specs,
        out_specs=_const_spec((B, input_dim)),
        scratch_shapes=[pltpu.VMEM((B, H), jnp.float32)],
        compiler_params=pltpu.CompilerParams(dimension_semantics=("arbitrary",)),
        cost_estimate=cost,
    )(*blk_args)
    return out


# ----------------------------------------------------------------------------
if __name__ == "__main__":
    B, input_dim, hidden, num_layers, num_heads, cond_dim = 2, 16, 32, 2, 4, 8
    mlp_ratio = 4.0  # num_heads is mathematically inert at seq_len == 1

    key = jax.random.PRNGKey(0)
    kx, kt, kc, kp = jax.random.split(key, 4)
    x_gene = jax.random.normal(kx, (B, input_dim), jnp.float32)
    t = jax.random.uniform(kt, (B,), jnp.float32) * 1000.0
    cond = jax.random.normal(kc, (B, cond_dim), jnp.float32)

    params = init_params(kp, input_dim, hidden, num_layers, mlp_ratio, cond_dim)

    out = conditional_dit_forward(params, x_gene, t, cond)
    jax.block_until_ready(out)
    assert out.shape == (B, input_dim)
    assert jnp.all(jnp.isfinite(out))
    print("KERNEL_OK")
</pallas_src>

<mosaic_0001>
module attributes {stable_mosaic.version = 11 : i64} {
  func.func @_head_kernel(%arg0: i32, %arg1: memref<2x256xf32, #tpu.memory_space<vmem>>, %arg2: memref<2x16xf32, #tpu.memory_space<vmem>>, %arg3: memref<2x8xf32, #tpu.memory_space<vmem>>, %arg4: memref<256x32xbf16, #tpu.memory_space<vmem>>, %arg5: memref<1x32xf32, #tpu.memory_space<vmem>>, %arg6: memref<32x32xbf16, #tpu.memory_space<vmem>>, %arg7: memref<1x32xf32, #tpu.memory_space<vmem>>, %arg8: memref<16x32xbf16, #tpu.memory_space<vmem>>, %arg9: memref<1x32xf32, #tpu.memory_space<vmem>>, %arg10: memref<8x32xbf16, #tpu.memory_space<vmem>>, %arg11: memref<1x32xf32, #tpu.memory_space<vmem>>, %arg12: memref<2x32xf32, #tpu.memory_space<vmem>>, %arg13: memref<2x32xf32, #tpu.memory_space<vmem>>) attributes {dimension_semantics = [#tpu.dimension_semantics<arbitrary>], iteration_bounds = array<i64: 1>, scalar_prefetch = 0 : i64, scratch_operands = 0 : i64, tpu.core_type = #tpu.core_type<tc>, window_params = [{pipeline_mode = #tpu.pipeline_mode<synchronous>, transform_indices = @transform_0, window_bounds = array<i64: 2, 256>}, {pipeline_mode = #tpu.pipeline_mode<synchronous>, transform_indices = @transform_1, window_bounds = array<i64: 2, 16>}, {pipeline_mode = #tpu.pipeline_mode<synchronous>, transform_indices = @transform_2, window_bounds = array<i64: 2, 8>}, {pipeline_mode = #tpu.pipeline_mode<synchronous>, transform_indices = @transform_3, window_bounds = array<i64: 256, 32>}, {pipeline_mode = #tpu.pipeline_mode<synchronous>, transform_indices = @transform_4, window_bounds = array<i64: 1, 32>}, {pipeline_mode = #tpu.pipeline_mode<synchronous>, transform_indices = @transform_5, window_bounds = array<i64: 32, 32>}, {pipeline_mode = #tpu.pipeline_mode<synchronous>, transform_indices = @transform_6, window_bounds = array<i64: 1, 32>}, {pipeline_mode = #tpu.pipeline_mode<synchronous>, transform_indices = @transform_7, window_bounds = array<i64: 16, 32>}, {pipeline_mode = #tpu.pipeline_mode<synchronous>, transform_indices = @transform_8, window_bounds = array<i64: 1, 32>}, {pipeline_mode = #tpu.pipeline_mode<synchronous>, transform_indices = @transform_9, window_bounds = array<i64: 8, 32>}, {pipeline_mode = #tpu.pipeline_mode<synchronous>, transform_indices = @transform_10, window_bounds = array<i64: 1, 32>}, {pipeline_mode = #tpu.pipeline_mode<synchronous>, transform_indices = @transform_11, window_bounds = array<i64: 2, 32>}, {pipeline_mode = #tpu.pipeline_mode<synchronous>, transform_indices = @transform_12, window_bounds = array<i64: 2, 32>}]} {
    %c0 = arith.constant 0 : index
    %c0_0 = arith.constant 0 : index
    %0 = vector.load %arg1[%c0, %c0_0] : memref<2x256xf32, #tpu.memory_space<vmem>>, vector<2x256xf32>
    %c0_1 = arith.constant 0 : index
    %c0_2 = arith.constant 0 : index
    %1 = vector.load %arg4[%c0_1, %c0_2] : memref<256x32xbf16, #tpu.memory_space<vmem>>, vector<256x32xbf16>
    %c0_3 = arith.constant 0 : index
    %c0_4 = arith.constant 0 : index
    %2 = vector.load %arg5[%c0_3, %c0_4] : memref<1x32xf32, #tpu.memory_space<vmem>>, vector<1x32xf32>
    %3 = arith.truncf %0 : vector<2x256xf32> to vector<2x256xbf16>
    %cst = arith.constant dense<0.000000e+00> : vector<2x32xf32>
    %4 = tpu.matmul %3, %1, %cst {dimension_numbers = #tpu.dot_dimension_numbers<[1], [0], [0], [1], [0, 0, 1, 1], [], []>} : vector<2x256xbf16>, vector<256x32xbf16>, vector<2x32xf32> -> vector<2x32xf32>
    %5 = vector.broadcast %2 : vector<1x32xf32> to vector<2x32xf32>
    %6 = arith.addf %4, %5 : vector<2x32xf32>
    %7 = arith.negf %6 : vector<2x32xf32>
    %8 = math.exp %7 : vector<2x32xf32>
    %cst_5 = arith.constant 1.000000e+00 : f32
    %9 = vector.broadcast %cst_5 : f32 to vector<2x32xf32>
    %10 = arith.addf %9, %8 : vector<2x32xf32>
    %11 = arith.divf %9, %10 : vector<2x32xf32>
    %12 = arith.mulf %6, %11 : vector<2x32xf32>
    %c0_6 = arith.constant 0 : index
    %c0_7 = arith.constant 0 : index
    %13 = vector.load %arg6[%c0_6, %c0_7] : memref<32x32xbf16, #tpu.memory_space<vmem>>, vector<32x32xbf16>
    %c0_8 = arith.constant 0 : index
    %c0_9 = arith.constant 0 : index
    %14 = vector.load %arg7[%c0_8, %c0_9] : memref<1x32xf32, #tpu.memory_space<vmem>>, vector<1x32xf32>
    %15 = arith.truncf %12 : vector<2x32xf32> to vector<2x32xbf16>
    %cst_10 = arith.constant dense<0.000000e+00> : vector<2x32xf32>
    %16 = tpu.matmul %15, %13, %cst_10 {dimension_numbers = #tpu.dot_dimension_numbers<[1], [0], [0], [1], [0, 0, 1, 1], [], []>} : vector<2x32xbf16>, vector<32x32xbf16>, vector<2x32xf32> -> vector<2x32xf32>
    %17 = vector.broadcast %14 : vector<1x32xf32> to vector<2x32xf32>
    %18 = arith.addf %16, %17 : vector<2x32xf32>
    %c0_11 = arith.constant 0 : index
    %c0_12 = arith.constant 0 : index
    %19 = vector.load %arg3[%c0_11, %c0_12] : memref<2x8xf32, #tpu.memory_space<vmem>>, vector<2x8xf32>
    %c0_13 = arith.constant 0 : index
    %c0_14 = arith.constant 0 : index
    %20 = vector.load %arg10[%c0_13, %c0_14] : memref<8x32xbf16, #tpu.memory_space<vmem>>, vector<8x32xbf16>
    %c0_15 = arith.constant 0 : index
    %c0_16 = arith.constant 0 : index
    %21 = vector.load %arg11[%c0_15, %c0_16] : memref<1x32xf32, #tpu.memory_space<vmem>>, vector<1x32xf32>
    %22 = arith.truncf %19 : vector<2x8xf32> to vector<2x8xbf16>
    %cst_17 = arith.constant dense<0.000000e+00> : vector<2x32xf32>
    %23 = tpu.matmul %22, %20, %cst_17 {dimension_numbers = #tpu.dot_dimension_numbers<[1], [0], [0], [1], [0, 0, 1, 1], [], []>} : vector<2x8xbf16>, vector<8x32xbf16>, vector<2x32xf32> -> vector<2x32xf32>
    %24 = vector.broadcast %21 : vector<1x32xf32> to vector<2x32xf32>
    %25 = arith.addf %23, %24 : vector<2x32xf32>
    %26 = arith.addf %18, %25 : vector<2x32xf32>
    %c0_18 = arith.constant 0 : index
    %c0_19 = arith.constant 0 : index
    %27 = vector.load %arg13[%c0_18, %c0_19] : memref<2x32xf32, #tpu.memory_space<vmem>>, vector<2x32xf32>
    tpu.vector_store %arg13[%c0_18, %c0_19], %26 {strides = array<i32>} : memref<2x32xf32, #tpu.memory_space<vmem>>, vector<2x32xf32>,
    %c0_20 = arith.constant 0 : index
    %c0_21 = arith.constant 0 : index
    %28 = vector.load %arg2[%c0_20, %c0_21] : memref<2x16xf32, #tpu.memory_space<vmem>>, vector<2x16xf32>
    %c0_22 = arith.constant 0 : index
    %c0_23 = arith.constant 0 : index
    %29 = vector.load %arg8[%c0_22, %c0_23] : memref<16x32xbf16, #tpu.memory_space<vmem>>, vector<16x32xbf16>
    %c0_24 = arith.constant 0 : index
    %c0_25 = arith.constant 0 : index
    %30 = vector.load %arg9[%c0_24, %c0_25] : memref<1x32xf32, #tpu.memory_space<vmem>>, vector<1x32xf32>
    %31 = arith.truncf %28 : vector<2x16xf32> to vector<2x16xbf16>
    %cst_26 = arith.constant dense<0.000000e+00> : vector<2x32xf32>
    %32 = tpu.matmul %31, %29, %cst_26 {dimension_numbers = #tpu.dot_dimension_numbers<[1], [0], [0], [1], [0, 0, 1, 1], [], []>} : vector<2x16xbf16>, vector<16x32xbf16>, vector<2x32xf32> -> vector<2x32xf32>
    %33 = vector.broadcast %30 : vector<1x32xf32> to vector<2x32xf32>
    %34 = arith.addf %32, %33 : vector<2x32xf32>
    %c0_27 = arith.constant 0 : index
    %c0_28 = arith.constant 0 : index
    %35 = vector.load %arg12[%c0_27, %c0_28] : memref<2x32xf32, #tpu.memory_space<vmem>>, vector<2x32xf32>
    tpu.vector_store %arg12[%c0_27, %c0_28], %34 {strides = array<i32>} : memref<2x32xf32, #tpu.memory_space<vmem>>, vector<2x32xf32>,
    return
  }
  func.func @transform_0(%arg0: i32) -> (i32, i32) {
    %c0_i32 = arith.constant 0 : i32
    %c0_i32_0 = arith.constant 0 : i32
    %c0_i32_1 = arith.constant 0 : i32
    return %c0_i32, %c0_i32_0 : i32, i32
  }
  func.func @transform_1(%arg0: i32) -> (i32, i32) {
    %c0_i32 = arith.constant 0 : i32
    %c0_i32_0 = arith.constant 0 : i32
    %c0_i32_1 = arith.constant 0 : i32
    return %c0_i32, %c0_i32_0 : i32, i32
  }
  func.func @transform_2(%arg0: i32) -> (i32, i32) {
    %c0_i32 = arith.constant 0 : i32
    %c0_i32_0 = arith.constant 0 : i32
    %c0_i32_1 = arith.constant 0 : i32
    return %c0_i32, %c0_i32_0 : i32, i32
  }
  func.func @transform_3(%arg0: i32) -> (i32, i32) {
    %c0_i32 = arith.constant 0 : i32
    %c0_i32_0 = arith.constant 0 : i32
    %c0_i32_1 = arith.constant 0 : i32
    return %c0_i32, %c0_i32_0 : i32, i32
  }
  func.func @transform_4(%arg0: i32) -> (i32, i32) {
    %c0_i32 = arith.constant 0 : i32
    %c0_i32_0 = arith.constant 0 : i32
    %c0_i32_1 = arith.constant 0 : i32
    return %c0_i32, %c0_i32_0 : i32, i32
  }
  func.func @transform_5(%arg0: i32) -> (i32, i32) {
    %c0_i32 = arith.constant 0 : i32
    %c0_i32_0 = arith.constant 0 : i32
    %c0_i32_1 = arith.constant 0 : i32
    return %c0_i32, %c0_i32_0 : i32, i32
  }
  func.func @transform_6(%arg0: i32) -> (i32, i32) {
    %c0_i32 = arith.constant 0 : i32
    %c0_i32_0 = arith.constant 0 : i32
    %c0_i32_1 = arith.constant 0 : i32
    return %c0_i32, %c0_i32_0 : i32, i32
  }
  func.func @transform_7(%arg0: i32) -> (i32, i32) {
    %c0_i32 = arith.constant 0 : i32
    %c0_i32_0 = arith.constant 0 : i32
    %c0_i32_1 = arith.constant 0 : i32
    return %c0_i32, %c0_i32_0 : i32, i32
  }
  func.func @transform_8(%arg0: i32) -> (i32, i32) {
    %c0_i32 = arith.constant 0 : i32
    %c0_i32_0 = arith.constant 0 : i32
    %c0_i32_1 = arith.constant 0 : i32
    return %c0_i32, %c0_i32_0 : i32, i32
  }
  func.func @transform_9(%arg0: i32) -> (i32, i32) {
    %c0_i32 = arith.constant 0 : i32
    %c0_i32_0 = arith.constant 0 : i32
    %c0_i32_1 = arith.constant 0 : i32
    return %c0_i32, %c0_i32_0 : i32, i32
  }
  func.func @transform_10(%arg0: i32) -> (i32, i32) {
    %c0_i32 = arith.constant 0 : i32
    %c0_i32_0 = arith.constant 0 : i32
    %c0_i32_1 = arith.constant 0 : i32
    return %c0_i32, %c0_i32_0 : i32, i32
  }
  func.func @transform_11(%arg0: i32) -> (i32, i32) {
    %c0_i32 = arith.constant 0 : i32
    %c0_i32_0 = arith.constant 0 : i32
    %c0_i32_1 = arith.constant 0 : i32
    return %c0_i32, %c0_i32_0 : i32, i32
  }
  func.func @transform_12(%arg0: i32) -> (i32, i32) {
    %c0_i32 = arith.constant 0 : i32
    %c0_i32_0 = arith.constant 0 : i32
    %c0_i32_1 = arith.constant 0 : i32
    return %c0_i32, %c0_i32_0 : i32, i32
  }
}

</mosaic_0001>

<bundles_post_ra>
// kernel: tpu_custom_call.1
= control target key start
LH: loop header
LB: loop body
LE: loop exit
PB: predicated region body
PF: predicated region fallthrough
CT: control target
= control target key end

     0   :  { %18 = vsyncpa [#allocation3], 0  ;;  %s678_s0 = inlined_call_operand.vmem [shape: f32[2,256], index: 0, kind: input, shape index: {}]   ;;  %s679_s1 = inlined_call_operand.vmem [shape: f32[2,16], index: 1, kind: input, shape index: {}]   ;;  %s680_s2 = inlined_call_operand.vmem [shape: f32[2,8], index: 2, kind: input, shape index: {}]   ;;  %s681_s3 = inlined_call_operand.vmem [shape: bf16[256,32], index: 3, kind: input, shape index: {}]   ;;  %s682_s4 = inlined_call_operand.vmem [shape: f32[1,32], index: 4, kind: input, shape index: {}]   ;;  %s683_s5 = inlined_call_operand.vmem [shape: bf16[32,32], index: 5, kind: input, shape index: {}]   ;;  %s684_s6 = inlined_call_operand.vmem [shape: f32[1,32], index: 6, kind: input, shape index: {}]   ;;  %s685_s7 = inlined_call_operand.vmem [shape: bf16[16,32], index: 7, kind: input, shape index: {}]   ;;  %s686_s8 = inlined_call_operand.vmem [shape: f32[1,32], index: 8, kind: input, shape index: {}]   ;;  %s687_s9 = inlined_call_operand.vmem [shape: bf16[8,32], index: 9, kind: input, shape index: {}]   ;;  %s688_s10 = inlined_call_operand.vmem [shape: f32[1,32], index: 10, kind: input, shape index: {}]   ;;  %s689_s11 = inlined_call_operand.hbm [shape: f32[2,32], index: 11, kind: output, shape index: {0}]   ;;  %s690_s12 = inlined_call_operand.hbm [shape: f32[2,32], index: 12, kind: output, shape index: {1}]  }
   0x1   :  { %v450_v0 = vld [vmem:[%s681_s3 + $0x38] sm:$0xff]  ;;  %v449_v2 = vld [vmem:[%s681_s3 + $0x30] sm:$0xff]  ;;  %v43_v4 = vld [vmem:[%s678_s0] sm:$0xf] }
   0x2   :  { %v458_v1 = vld [vmem:[%s681_s3 + $0x78] sm:$0xff]  ;;  %184 = vmatpush.bf16.msra.mxu0 %v450_v0  ;;  %v457_v3 = vld [vmem:[%s681_s3 + $0x70] sm:$0xff]  ;;  %v448_v5 = vld [vmem:[%s681_s3 + $0x28] sm:$0xff]  ;;  %78 = vst [vmem:[#allocation1] ss:$4 sm:$0xff] %v43_v4 }
   0x3   :  { %197 = vmatpush.bf16.msra.mxu1 %v458_v1  ;;  %v456_v6 = vld [vmem:[%s681_s3 + $0x68] sm:$0xff] }
   0x6   :  { %185 = vmatpush.bf16.msra.mxu0 %v449_v2 }
   0x7   :  { %198 = vmatpush.bf16.msra.mxu1 %v457_v3 }
   0x8   :  { %19 = vsyncpa [#allocation5], 0  ;;  %v447_v7 = vld [vmem:[%s681_s3 + $0x20] sm:$0xff]  ;;  %v446_v9 = vld [vmem:[%s681_s3 + $0x18] sm:$0xff]  ;;  %vm279_vm0 = vcmask 1043456   ;;  %vm275_vm1 = vcmask 64512  }
   0x9   :  { %v455_v8 = vld [vmem:[%s681_s3 + $0x60] sm:$0xff]  ;;  %v454_v10 = vld [vmem:[%s681_s3 + $0x58] sm:$0xff]  ;;  %v445_v11 = vld [vmem:[%s681_s3 + $0x10] sm:$0xff]  ;;  %vm313_vm2 = vcmask 130048   ;;  %vm251_vm7 = vcmask 261120   ;;  %s338_s30 = sshll.u32 %s689_s11, 4  ;;  %s339_s30 = int_to_ptr.hbm [resolvable:$true] %s338_s30 }
   0xa   :  { %186 = vmatpush.bf16.msra.mxu0 %v448_v5  ;;  %v453_v12 = vld [vmem:[%s681_s3 + $0x50] sm:$0xff]  ;;  %v444_v13 = vld [vmem:[%s681_s3 + $0x8] sm:$0xff]  ;;  %v443_v15 = vld [vmem:[%s681_s3] sm:$0xff]  ;;  %vm297_vm8 = vcmask 254976   ;;  %s349_s19 = sshll.u32 %s690_s12, 4  ;;  %s350_s19 = int_to_ptr.hbm [resolvable:$true] %s349_s19 }
   0xb   :  { %199 = vmatpush.bf16.msra.mxu1 %v456_v6  ;;  %v452_v14 = vld [vmem:[%s681_s3 + $0x48] sm:$0xff]  ;;  %v451_v16 = vld [vmem:[%s681_s3 + $0x40] sm:$0xff] }
   0xc   :  { %v79_v17 = vld.sshfl [vmem:[#allocation1] sm:$0xff pattern:$0x73625140]  ;;  %v80_v18 = vld.sshfl [vmem:[#allocation1 + $0x8] sm:$0xff pattern:$0x73625140] }
   0xd   :  { %v83_v19 = vpack.c.bf16 %v79_v17, %v79_v17  ;;  %v84_v20 = vpack.c.bf16 %v80_v18, %v80_v18  ;;  %v269_v21 = vld [vmem:[%s687_s9] sm:$0xf]  ;;  %v460_v28 = vld [vmem:[%s683_s5 + $0x8] sm:$0xff] }
   0xe   :  { %187 = vmatpush.bf16.msra.mxu0 %v447_v7  ;;  %v281_v22 = vsel %vm279_vm0, %v269_v21, 0  ;;  %v268_v23 = vld [vmem:[%s680_s2] sm:$0x3]  ;;  %261 = vmatpush.bf16.msra.mxu2 %v460_v28 }
   0xf   :  { %200 = vmatpush.bf16.msra.mxu1 %v455_v8  ;;  %290 = vmatpush.bf16.msra.mxu3 %v281_v22  ;;  %v271_v24 = vpack.c.bf16 %v268_v23, %v268_v23  ;;  %v461_v25 = vld [vmem:[%s685_s7] sm:$0xff] }
  0x10   :  { %v299_v26 = vld [vmem:[%s679_s1] sm:$0x3] }
  0x11   :  { %v303_v27 = vpack.c.bf16 %v299_v26, %v299_v26  ;;  %v464_v29 = vld [vmem:[%s682_s4] ss:$0 sm:$0xff] }
  0x12   :  { %188 = vmatpush.bf16.msra.mxu0 %v446_v9  ;;  %437 = vmatmul.msk.bf16.vlgmr.msra.gmra.mxu3 %vm275_vm1, %v271_v24  ;;  %v459_v32 = vld [vmem:[%s683_s5] sm:$0xff]  ;;  %s524_s5 = smov [#allocation2]  }
  0x13   :  { %201 = vmatpush.bf16.msra.mxu1 %v454_v10  ;;  %324 = vmatpush.bf16.msrb.mxu3 %v461_v25  ;;  %v466_v55 = vld [vmem:[%s686_s8] ss:$0 sm:$0xff]  ;;  %s336_s27 = sshll.u32 %s524_s5, 4  ;;  %s525_s8 = smov [#allocation4]   ;;  %s337_s27 = int_to_ptr.vmem [resolvable:$true] %s336_s27 }
  0x14   :  { %262 = vmatpush.bf16.msra.mxu2 %v459_v32  ;;  %v465_v58 = vld [vmem:[%s688_s10] ss:$0 sm:$0xff]  ;;  %s347_s17 = sshll.u32 %s525_s8, 4  ;;  %s348_s17 = int_to_ptr.vmem [resolvable:$true] %s347_s17 }
  0x15   :  { %v467_v59 = vld [vmem:[%s684_s6] ss:$0 sm:$0xff] }
  0x16   :  { %189 = vmatpush.bf16.msra.mxu0 %v445_v11 }
  0x17   :  { %202 = vmatpush.bf16.msra.mxu1 %v453_v12 }
  0x1a   :  { %190 = vmatpush.bf16.msra.mxu0 %v444_v13 }
  0x1b   :  { %203 = vmatpush.bf16.msra.mxu1 %v452_v14 }
  0x1e   :  { %191 = vmatpush.bf16.msra.mxu0 %v443_v15 }
  0x1f   :  { %204 = vmatpush.bf16.msra.mxu1 %v451_v16 }
  0x21   :  { %192 = vmatmul.bf16.vlgmr.msra.gmra.mxu0 %v83_v19 }
  0x22   :  { %205 = vmatmul.bf16.vlgmr.msra.gmra.mxu1 %v84_v20  ;;  %442 = vmatmul.msk.bf16.vlgmr.msrb.gmra.mxu3 %vm313_vm2, %v303_v27 }
  0x95   :  { %v292_v52 = vpop.f32.mrf.mxu3 }
  0x96   :  { %v293_v61 = vadd.f32 %v465_v58, %v292_v52 }
  0x9d   :  { %v294_v53 = vpop.f32.mrf.mxu3 }
  0x9e   :  { %v193_v30 = vpop.f32.mrf.mxu0 }
  0x9f   :  { %v206_v31 = vpop.f32.mrf.mxu1  ;;  %v194_v33 = vadd.f32 %v464_v29, %v193_v30 }
  0xa1   :  { %v207_v34 = vadd.f32 %v206_v31, %v194_v33 }
  0xa3   :  { %v427_v35 = vmul.f32 -1.442695, %v207_v34 }
  0xa5   :  { %468 = vpow2.f32 %v427_v35  ;;  %v326_v54 = vpop.f32.mrf.mxu3 }
  0xa6   :  { %v195_v36 = vpop.f32.mrf.mxu0  ;;  %v327_v56 = vadd.f32 %v466_v55, %v326_v54 }
  0xa7   :  { %v208_v37 = vpop.f32.mrf.mxu1 }
  0xa8   :  { %330 = vst.msk [vmem:[#allocation2] sm:$0x3] %vm297_vm8, %v327_v56 }
  0xa9   :  { %341 = dma.vmem_to_hbm [thread:$0]  %s337_s27, 32, %s339_s30, [#allocation3]  }
  0xab   :  { %v469_v38 = vpop.eup %468 }
  0xac   :  { %v213_v39 = vadd.f32 1.0, %v469_v38 }
  0xad   :  { %v328_v57 = vpop.f32.mrf.mxu3 }
  0xae   :  { %470 = vrcp.f32 %v213_v39  ;;  %v225_v43 = vand.u32 2147483648, %v213_v39  ;;  %v223_v45 = vand.u32 2147483647, %v213_v39  ;;  %vm219_vm4 = vweird.f32 %v213_v39 }
  0xb0   :  { %v226_v47 = vor.u32 1.1754944e-38, %v225_v43  ;;  %vm224_vm6 = vcmp.eq.f32.partialorder %v223_v45, 8.507059e+37 }
  0xb4   :  { %v471_v40 = vpop.eup %470 }
  0xb5   :  { %v215_v41 = vmul.f32 %v471_v40, %v213_v39  ;;  %vm220_vm3 = vweird.f32 %v471_v40 }
  0xb6   :  { %vm221_vm5 = vmor %vm219_vm4, %vm220_vm3 }
  0xb7   :  { %v216_v42 = vsub.f32 1.0, %v215_v41 }
  0xb9   :  { %v217_v44 = vmul.f32 %v471_v40, %v216_v42 }
  0xbb   :  { %v218_v46 = vadd.f32 %v471_v40, %v217_v44 }
  0xbd   :  { %v222_v48 = vsel %vm221_vm5, %v471_v40, %v218_v46 }
  0xbe   :  { %v227_v49 = vsel %vm224_vm6, %v226_v47, %v222_v48 }
  0xbf   :  { %v229_v50 = vmul.f32 %v227_v49, %v207_v34 }
  0xc1   :  { %v235_v51 = vpack.c.bf16 %v229_v50, %v229_v50 }
  0xc3   :  { %436 = vmatmul.msk.bf16.vlgmr.msra.gmra.mxu2 %vm251_vm7, %v235_v51 }
 0x146   :  { %v264_v60 = vpop.f32.mrf.mxu2 }
 0x147   :  { %v265_v62 = vadd.f32 %v467_v59, %v264_v60 }
 0x149   :  { %v296_v63 = vadd.f32 %v293_v61, %v265_v62 }
 0x14b   :  { %298 = vst.msk [vmem:[#allocation4] sm:$0x3] %vm297_vm8, %v296_v63 }
 0x14c   :  { %352 = dma.vmem_to_hbm [thread:$0]  %s348_s17, 32, %s350_s19, [#allocation5]  }
 0x14e   :  { %v266_v0 = vpop.f32.mrf.mxu2 }
 0x14f   :  { %520 = dma.done.wait [#allocation3], 32  }
 0x150   :  { %521 = vsyncadd [#allocation3], 4294967264 }
 0x151   :  { %522 = dma.done.wait [#allocation5], 32  }
 0x152   :  { %523 = vsyncadd [#allocation5], 4294967264 }
 0x153   :  { %361 = vsyncpa [#allocation3], 1 }
 0x154   :  { %362 = vsyncpa [#allocation5], 1 }

</bundles_post_ra>
